<compile_context>
chip_gen: v6e
topology: v6e:2x2x1
jax: 0.10.0
libtpu: 0.0.40
codegen_flags: <defaults>
</compile_context>

<pallas_src>
import math

import jax
import jax.numpy as jnp
from jax.experimental import pallas as pl
from jax.experimental.pallas import tpu as pltpu

IN_FEATURES = 28 * 28   # 784
OUT_FEATURES = 10


def linear_kernel(x_ref, w_ref, b_ref, o_ref):
    # x_ref: (TB, 784)  w_ref: (784, 10)  b_ref: (1, 10)  o_ref: (TB, 10)
    acc = jnp.dot(x_ref[...], w_ref[...], preferred_element_type=jnp.float32)
    o_ref[...] = (acc + b_ref[...]).astype(o_ref.dtype)


def _round_up(n, m):
    return ((n + m - 1) // m) * m


def _default_block_b():
    # v6e/v7x: 32 MiB scoped-VMEM default fits a 2048-row f32 x tile
    # (2048 x 896 lane-padded x 4 B ~= 7.3 MiB, ~14.7 MiB double-buffered).
    # v5e (and older): 16 MiB scoped default -> stay at 1024 rows.
    try:
        kind = jax.devices()[0].device_kind.lower()
    except Exception:
        return 1024
    if "v6" in kind or "v7" in kind:
        return 2048
    return 1024


def _choose_tile(batch, block_b):
    block_b = max(8, (block_b // 8) * 8)  # keep sublane-aligned
    if batch < 64:
        # Tiny batch: one block (or a caller-forced smaller tile); launch
        # overhead dominates here anyway.
        return min(batch, block_b)
    # Aim for >= 4 grid steps so both v7x TensorCores get tiles and the x-DMA
    # pipeline has depth; harmless on single-TC v5e/v6e.
    target = max(8, _round_up(pl.cdiv(batch, 4), 8))
    return min(block_b, target)


def net_forward(x, weight, bias, *, block_b=None):
    """Forward pass of Net: out = x.reshape(-1, 784) @ W + b.

    x:      (B, 1, 28, 28) or (B, 784).  Computed in x.dtype -- no wrapper-side
            cast of x (a cast would add an extra HBM round-trip on this
            bandwidth-bound kernel); supply bf16 data upstream if desired.
    weight: (784, 10) -- transposed vs. torch nn.Linear's (10, 784) layout.
    bias:   (10,)
    block_b: rows per batch tile (default: generation-aware).
    returns (B, 10) float32.
    """
    x2d = x.reshape(-1, IN_FEATURES)
    w = weight.astype(x2d.dtype)                       # tiny (31 KB): free cast
    b2d = bias.reshape(1, OUT_FEATURES).astype(jnp.float32)
    B = x2d.shape[0]

    if block_b is None:
        block_b = _default_block_b()
    tb = _choose_tile(B, block_b)
    grid = (pl.cdiv(B, tb),)

    itemsize = jnp.dtype(x2d.dtype).itemsize
    cost = pl.CostEstimate(
        flops=2 * B * IN_FEATURES * OUT_FEATURES,
        transcendentals=0,
        bytes_accessed=(B * IN_FEATURES * itemsize            # x read
                        + B * OUT_FEATURES * 4                # out write
                        + IN_FEATURES * OUT_FEATURES * itemsize  # W read
                        + OUT_FEATURES * 4),                  # b read
    )

    return pl.pallas_call(
        linear_kernel,
        out_shape=jax.ShapeDtypeStruct((B, OUT_FEATURES), jnp.float32),
        grid=grid,
        in_specs=[
            # x tile: default double-buffering -> DMA overlaps MXU.
            pl.BlockSpec((tb, IN_FEATURES), lambda i: (i, 0)),
            # W / b: constant index_map -> resident across the grid; a single
            # pipeline buffer saves ~0.4 MiB VMEM (x-tile headroom on v5e).
            pl.BlockSpec((IN_FEATURES, OUT_FEATURES), lambda i: (0, 0),
                         pipeline_mode=pl.Buffered(1)),
            pl.BlockSpec((1, OUT_FEATURES), lambda i: (0, 0),
                         pipeline_mode=pl.Buffered(1)),
        ],
        # Output stays 10-wide: the masked partial stores are hidden under the
        # x-tile DMA (store slot is far from saturated).
        out_specs=pl.BlockSpec((tb, OUT_FEATURES), lambda i: (i, 0)),
        compiler_params=pltpu.CompilerParams(
            # Batch tiles are independent -> shard across TensorCores on v7x.
            dimension_semantics=("parallel",),
        ),
        cost_estimate=cost,
    )(x2d, w, b2d)


def init_params(key):
    """Deterministic init matching nn.Linear's default (uniform +/- 1/sqrt(fan_in))."""
    k_w, k_b = jax.random.split(key)
    bound = 1.0 / math.sqrt(IN_FEATURES)
    weight = jax.random.uniform(
        k_w, (IN_FEATURES, OUT_FEATURES), jnp.float32, -bound, bound
    )
    bias = jax.random.uniform(
        k_b, (OUT_FEATURES,), jnp.float32, -bound, bound
    )
    return weight, bias


if __name__ == "__main__":
    key = jax.random.PRNGKey(0)
    k_x, k_p = jax.random.split(key)

    # Small MNIST-like batch: NCHW (B=16, C=1, H=28, W=28)
    x = jax.random.normal(k_x, (16, 1, 28, 28), jnp.float32)
    weight, bias = init_params(k_p)

    ref = x.reshape(-1, IN_FEATURES) @ weight + bias

    # 1) Default f32 path (B=16 -> single full-batch block).
    out = jax.block_until_ready(net_forward(x, weight, bias))
    assert out.shape == (16, OUT_FEATURES)
    assert jnp.allclose(out, ref, atol=1e-5, rtol=1e-5)

    # 2) Multi-tile path (grid = 2 steps with TB=8) -- exercises pipelining.
    out_tiled = jax.block_until_ready(net_forward(x, weight, bias, block_b=8))
    assert jnp.allclose(out_tiled, ref, atol=1e-5, rtol=1e-5)

    # 3) bf16-stored inputs: caller supplies bf16 x, no wrapper cast of x.
    x_bf16 = x.astype(jnp.bfloat16)
    out_bf16 = jax.block_until_ready(net_forward(x_bf16, weight, bias, block_b=8))
    assert jnp.allclose(out_bf16, ref, atol=5e-2, rtol=5e-2)

    print("KERNEL_OK")
</pallas_src>

<mosaic_0001>
module attributes {stable_mosaic.version = 11 : i64} {
  func.func @linear_kernel(%arg0: i32, %arg1: memref<16x784xf32, #tpu.memory_space<vmem>>, %arg2: memref<784x10xf32, #tpu.memory_space<vmem>>, %arg3: memref<1x10xf32, #tpu.memory_space<vmem>>, %arg4: memref<16x10xf32, #tpu.memory_space<vmem>>) attributes {dimension_semantics = [#tpu.dimension_semantics<parallel>], iteration_bounds = array<i64: 1>, scalar_prefetch = 0 : i64, scratch_operands = 0 : i64, tpu.core_type = #tpu.core_type<tc>, window_params = [{transform_indices = @transform_0, window_bounds = array<i64: 16, 784>}, {pipeline_mode = #tpu.pipeline_mode<synchronous>, transform_indices = @transform_1, window_bounds = array<i64: 784, 10>}, {pipeline_mode = #tpu.pipeline_mode<synchronous>, transform_indices = @transform_2, window_bounds = array<i64: 1, 10>}, {transform_indices = @transform_3, window_bounds = array<i64: 16, 10>}]} {
    %c0 = arith.constant 0 : index
    %c0_0 = arith.constant 0 : index
    %0 = vector.load %arg1[%c0, %c0_0] : memref<16x784xf32, #tpu.memory_space<vmem>>, vector<16x784xf32>
    %c0_1 = arith.constant 0 : index
    %c0_2 = arith.constant 0 : index
    %1 = vector.load %arg2[%c0_1, %c0_2] : memref<784x10xf32, #tpu.memory_space<vmem>>, vector<784x10xf32>
    %cst = arith.constant dense<0.000000e+00> : vector<16x10xf32>
    %2 = tpu.matmul %0, %1, %cst {dimension_numbers = #tpu.dot_dimension_numbers<[1], [0], [0], [1], [0, 0, 1, 1], [], []>} : vector<16x784xf32>, vector<784x10xf32>, vector<16x10xf32> -> vector<16x10xf32>
    %c0_3 = arith.constant 0 : index
    %c0_4 = arith.constant 0 : index
    %3 = vector.load %arg3[%c0_3, %c0_4] : memref<1x10xf32, #tpu.memory_space<vmem>>, vector<1x10xf32>
    %4 = vector.broadcast %3 : vector<1x10xf32> to vector<16x10xf32>
    %5 = arith.addf %2, %4 : vector<16x10xf32>
    %c0_5 = arith.constant 0 : index
    %c0_6 = arith.constant 0 : index
    %6 = vector.load %arg4[%c0_5, %c0_6] : memref<16x10xf32, #tpu.memory_space<vmem>>, vector<16x10xf32>
    tpu.vector_store %arg4[%c0_5, %c0_6], %5 {strides = array<i32>} : memref<16x10xf32, #tpu.memory_space<vmem>>, vector<16x10xf32>,
    return
  }
  func.func @transform_0(%arg0: i32) -> (i32, i32) {
    %c0_i32 = arith.constant 0 : i32
    %c0_i32_0 = arith.constant 0 : i32
    return %arg0, %c0_i32 : i32, i32
  }
  func.func @transform_1(%arg0: i32) -> (i32, i32) {
    %c0_i32 = arith.constant 0 : i32
    %c0_i32_0 = arith.constant 0 : i32
    %c0_i32_1 = arith.constant 0 : i32
    return %c0_i32, %c0_i32_0 : i32, i32
  }
  func.func @transform_2(%arg0: i32) -> (i32, i32) {
    %c0_i32 = arith.constant 0 : i32
    %c0_i32_0 = arith.constant 0 : i32
    %c0_i32_1 = arith.constant 0 : i32
    return %c0_i32, %c0_i32_0 : i32, i32
  }
  func.func @transform_3(%arg0: i32) -> (i32, i32) {
    %c0_i32 = arith.constant 0 : i32
    %c0_i32_0 = arith.constant 0 : i32
    return %arg0, %c0_i32 : i32, i32
  }
}

</mosaic_0001>

<bundles_post_ra>
// kernel: tpu_custom_call.1
= control target key start
LH: loop header
LB: loop body
LE: loop exit
PB: predicated region body
PF: predicated region fallthrough
CT: control target
= control target key end

     0   :  { %s978_s0 = inlined_call_operand.vmem [shape: f32[16,784], index: 0, kind: input, shape index: {}]   ;;  %s979_s1 = inlined_call_operand.vmem [shape: f32[784,10], index: 1, kind: input, shape index: {}]   ;;  %s980_s2 = inlined_call_operand.vmem [shape: f32[1,10], index: 2, kind: input, shape index: {}]   ;;  %s981_s3 = inlined_call_operand.hbm [shape: f32[16,10], index: 3, kind: output, shape index: {}]  }
   0x1   :  { %v60_v0 = vld [vmem:[%s979_s1 + $0xf8] sm:$0xff]  ;;  %v59_v2 = vld [vmem:[%s979_s1 + $0xf0] sm:$0xff]  ;;  %v58_v6 = vld [vmem:[%s979_s1 + $0xe8] sm:$0xff] }
   0x2   :  { %v44_v1 = vld [vmem:[%s979_s1 + $0x78] sm:$0xff]  ;;  %463 = vmatprep.subr.mxu0 %v60_v0  ;;  %v43_v4 = vld [vmem:[%s979_s1 + $0x70] sm:$0xff]  ;;  %v42_v8 = vld [vmem:[%s979_s1 + $0x68] sm:$0xff] }
   0x3   :  { %v92_v3 = vld [vmem:[%s979_s1 + $0x1f8] sm:$0xff]  ;;  %464 = vmatpush3.msra.mxu0 %v44_v1  ;;  %v91_v7 = vld [vmem:[%s979_s1 + $0x1f0] sm:$0xff]  ;;  %v90_v10 = vld [vmem:[%s979_s1 + $0x1e8] sm:$0xff] }
   0x4   :  { %v76_v5 = vld [vmem:[%s979_s1 + $0x178] sm:$0xff]  ;;  %501 = vmatprep.subr.mxu1 %v92_v3  ;;  %465 = vmatprep.subr.mxu0 %v59_v2  ;;  %v75_v9 = vld [vmem:[%s979_s1 + $0x170] sm:$0xff]  ;;  %v57_v11 = vld [vmem:[%s979_s1 + $0xe0] sm:$0xff] }
   0x5   :  { %502 = vmatpush3.msra.mxu1 %v76_v5  ;;  %466 = vmatpush3.msra.mxu0 %v43_v4  ;;  %v74_v12 = vld [vmem:[%s979_s1 + $0x168] sm:$0xff]  ;;  %v41_v13 = vld [vmem:[%s979_s1 + $0x60] sm:$0xff]  ;;  %v56_v15 = vld [vmem:[%s979_s1 + $0xd8] sm:$0xff] }
   0x6   :  { %503 = vmatprep.subr.mxu1 %v91_v7  ;;  %467 = vmatprep.subr.mxu0 %v58_v6  ;;  %v89_v14 = vld [vmem:[%s979_s1 + $0x1e0] sm:$0xff]  ;;  %v40_v17 = vld [vmem:[%s979_s1 + $0x58] sm:$0xff]  ;;  %v55_v19 = vld [vmem:[%s979_s1 + $0xd0] sm:$0xff] }
   0x7   :  { %504 = vmatpush3.msra.mxu1 %v75_v9  ;;  %468 = vmatpush3.msra.mxu0 %v42_v8  ;;  %v73_v16 = vld [vmem:[%s979_s1 + $0x160] sm:$0xff]  ;;  %v88_v18 = vld [vmem:[%s979_s1 + $0x1d8] sm:$0xff]  ;;  %v39_v21 = vld [vmem:[%s979_s1 + $0x50] sm:$0xff] }
   0x8   :  { %505 = vmatprep.subr.mxu1 %v90_v10  ;;  %469 = vmatprep.subr.mxu0 %v57_v11  ;;  %v72_v20 = vld [vmem:[%s979_s1 + $0x158] sm:$0xff]  ;;  %v87_v22 = vld [vmem:[%s979_s1 + $0x1d0] sm:$0xff]  ;;  %v54_v23 = vld [vmem:[%s979_s1 + $0xc8] sm:$0xff] }
   0x9   :  { %506 = vmatpush3.msra.mxu1 %v74_v12  ;;  %470 = vmatpush3.msra.mxu0 %v41_v13  ;;  %v71_v24 = vld [vmem:[%s979_s1 + $0x150] sm:$0xff]  ;;  %v38_v25 = vld [vmem:[%s979_s1 + $0x48] sm:$0xff]  ;;  %v53_v27 = vld [vmem:[%s979_s1 + $0xc0] sm:$0xff] }
   0xa   :  { %507 = vmatprep.subr.mxu1 %v89_v14  ;;  %471 = vmatprep.subr.mxu0 %v56_v15  ;;  %v86_v26 = vld [vmem:[%s979_s1 + $0x1c8] sm:$0xff]  ;;  %v37_v29 = vld [vmem:[%s979_s1 + $0x40] sm:$0xff]  ;;  %v52_v31 = vld [vmem:[%s979_s1 + $0xb8] sm:$0xff] }
   0xb   :  { %508 = vmatpush3.msra.mxu1 %v73_v16  ;;  %472 = vmatpush3.msra.mxu0 %v40_v17  ;;  %v70_v28 = vld [vmem:[%s979_s1 + $0x148] sm:$0xff]  ;;  %v85_v30 = vld [vmem:[%s979_s1 + $0x1c0] sm:$0xff]  ;;  %v36_v33 = vld [vmem:[%s979_s1 + $0x38] sm:$0xff] }
   0xc   :  { %509 = vmatprep.subr.mxu1 %v88_v18  ;;  %473 = vmatprep.subr.mxu0 %v55_v19  ;;  %v69_v32 = vld [vmem:[%s979_s1 + $0x140] sm:$0xff]  ;;  %v84_v34 = vld [vmem:[%s979_s1 + $0x1b8] sm:$0xff]  ;;  %v51_v35 = vld [vmem:[%s979_s1 + $0xb0] sm:$0xff] }
   0xd   :  { %510 = vmatpush3.msra.mxu1 %v72_v20  ;;  %474 = vmatpush3.msra.mxu0 %v39_v21  ;;  %v68_v36 = vld [vmem:[%s979_s1 + $0x138] sm:$0xff]  ;;  %v35_v37 = vld [vmem:[%s979_s1 + $0x30] sm:$0xff]  ;;  %v50_v39 = vld [vmem:[%s979_s1 + $0xa8] sm:$0xff] }
   0xe   :  { %511 = vmatprep.subr.mxu1 %v87_v22  ;;  %475 = vmatprep.subr.mxu0 %v54_v23  ;;  %v83_v38 = vld [vmem:[%s979_s1 + $0x1b0] sm:$0xff]  ;;  %v34_v41 = vld [vmem:[%s979_s1 + $0x28] sm:$0xff]  ;;  %v49_v43 = vld [vmem:[%s979_s1 + $0xa0] sm:$0xff] }
   0xf   :  { %512 = vmatpush3.msra.mxu1 %v71_v24  ;;  %476 = vmatpush3.msra.mxu0 %v38_v25  ;;  %v67_v40 = vld [vmem:[%s979_s1 + $0x130] sm:$0xff]  ;;  %v82_v42 = vld [vmem:[%s979_s1 + $0x1a8] sm:$0xff]  ;;  %v33_v45 = vld [vmem:[%s979_s1 + $0x20] sm:$0xff] }
  0x10   :  { %513 = vmatprep.subr.mxu1 %v86_v26  ;;  %477 = vmatprep.subr.mxu0 %v53_v27  ;;  %v66_v44 = vld [vmem:[%s979_s1 + $0x128] sm:$0xff]  ;;  %v81_v46 = vld [vmem:[%s979_s1 + $0x1a0] sm:$0xff]  ;;  %v48_v47 = vld [vmem:[%s979_s1 + $0x98] sm:$0xff] }
  0x11   :  { %514 = vmatpush3.msra.mxu1 %v70_v28  ;;  %478 = vmatpush3.msra.mxu0 %v37_v29  ;;  %v65_v48 = vld [vmem:[%s979_s1 + $0x120] sm:$0xff]  ;;  %v32_v49 = vld [vmem:[%s979_s1 + $0x18] sm:$0xff]  ;;  %v47_v51 = vld [vmem:[%s979_s1 + $0x90] sm:$0xff] }
  0x12   :  { %515 = vmatprep.subr.mxu1 %v85_v30  ;;  %479 = vmatprep.subr.mxu0 %v52_v31  ;;  %v80_v50 = vld [vmem:[%s979_s1 + $0x198] sm:$0xff]  ;;  %v31_v53 = vld [vmem:[%s979_s1 + $0x10] sm:$0xff]  ;;  %v46_v55 = vld [vmem:[%s979_s1 + $0x88] sm:$0xff] }
  0x13   :  { %516 = vmatpush3.msra.mxu1 %v69_v32  ;;  %480 = vmatpush3.msra.mxu0 %v36_v33  ;;  %v64_v52 = vld [vmem:[%s979_s1 + $0x118] sm:$0xff]  ;;  %v79_v54 = vld [vmem:[%s979_s1 + $0x190] sm:$0xff]  ;;  %v30_v57 = vld [vmem:[%s979_s1 + $0x8] sm:$0xff] }
  0x14   :  { %517 = vmatprep.subr.mxu1 %v84_v34  ;;  %481 = vmatprep.subr.mxu0 %v51_v35  ;;  %v63_v56 = vld [vmem:[%s979_s1 + $0x110] sm:$0xff]  ;;  %v78_v58 = vld [vmem:[%s979_s1 + $0x188] sm:$0xff]  ;;  %v45_v59 = vld [vmem:[%s979_s1 + $0x80] sm:$0xff] }
  0x15   :  { %518 = vmatpush3.msra.mxu1 %v68_v36  ;;  %482 = vmatpush3.msra.mxu0 %v35_v37  ;;  %v16_v60 = vld [vmem:[%s978_s0 + $0x8] sm:$0xff]  ;;  %v29_v61 = vld [vmem:[%s979_s1] sm:$0xff]  ;;  %v124_v1 = vld [vmem:[%s979_s1 + $0x2f8] sm:$0xff] }
  0x16   :  { %519 = vmatprep.subr.mxu1 %v83_v38  ;;  %483 = vmatprep.subr.mxu0 %v50_v39  ;;  %v62_v62 = vld [vmem:[%s979_s1 + $0x108] sm:$0xff]  ;;  %v15_v63 = vld [vmem:[%s978_s0] sm:$0xff]  ;;  %v18_v3 = vld [vmem:[%s978_s0 + $0x18] sm:$0xff] }
  0x17   :  { %520 = vmatpush3.msra.mxu1 %v67_v40  ;;  %484 = vmatpush3.msra.mxu0 %v34_v41  ;;  %v77_v0 = vld [vmem:[%s979_s1 + $0x180] sm:$0xff]  ;;  %v108_v4 = vld [vmem:[%s979_s1 + $0x278] sm:$0xff]  ;;  %v17_v5 = vld [vmem:[%s978_s0 + $0x10] sm:$0xff] }
  0x18   :  { %521 = vmatprep.subr.mxu1 %v82_v42  ;;  %485 = vmatprep.subr.mxu0 %v49_v43  ;;  %v61_v2 = vld [vmem:[%s979_s1 + $0x100] sm:$0xff]  ;;  %v123_v6 = vld [vmem:[%s979_s1 + $0x2f0] sm:$0xff]  ;;  %v122_v9 = vld [vmem:[%s979_s1 + $0x2e8] sm:$0xff] }
  0x19   :  { %522 = vmatpush3.msra.mxu1 %v66_v44  ;;  %486 = vmatpush3.msra.mxu0 %v33_v45  ;;  %v107_v7 = vld [vmem:[%s979_s1 + $0x270] sm:$0xff]  ;;  %v23_v8 = vld [vmem:[%s978_s0 + $0x40] sm:$0xff]  ;;  %v22_v10 = vld [vmem:[%s978_s0 + $0x38] sm:$0xff] }
  0x1a   :  { %523 = vmatprep.subr.mxu1 %v81_v46  ;;  %487 = vmatprep.subr.mxu0 %v48_v47  ;;  %v106_v11 = vld [vmem:[%s979_s1 + $0x268] sm:$0xff]  ;;  %v25_v12 = vld [vmem:[%s978_s0 + $0x50] sm:$0xff]  ;;  %v121_v13 = vld [vmem:[%s979_s1 + $0x2e0] sm:$0xff] }
  0x1b   :  { %524 = vmatpush3.msra.mxu1 %v65_v48  ;;  %488 = vmatpush3.msra.mxu0 %v32_v49  ;;  %v24_v14 = vld [vmem:[%s978_s0 + $0x48] sm:$0xff] }
  0x1c   :  { %525 = vmatprep.subr.mxu1 %v80_v50  ;;  %489 = vmatprep.subr.mxu0 %v47_v51 }
  0x1d   :  { %526 = vmatpush3.msra.mxu1 %v64_v52  ;;  %490 = vmatpush3.msra.mxu0 %v31_v53 }
  0x1e   :  { %527 = vmatprep.subr.mxu1 %v79_v54  ;;  %491 = vmatprep.subr.mxu0 %v46_v55 }
  0x1f   :  { %528 = vmatpush3.msra.mxu1 %v63_v56  ;;  %492 = vmatpush3.msra.mxu0 %v30_v57 }
  0x20   :  { %529 = vmatprep.subr.mxu1 %v78_v58  ;;  %493 = vmatprep.subr.mxu0 %v45_v59 }
  0x21   :  { %205 = vmatprep.mubr.f32.mxu0 %v16_v60  ;;  %494 = vmatpush3.msra.mxu0 %v29_v61 }
  0x22   :  { %530 = vmatpush3.msra.mxu1 %v62_v62  ;;  %206 = vmatmul.mubr.f32.vlgmr.msra.gmra.mxu0 %v15_v63 }
  0x23   :  { %531 = vmatprep.subr.mxu1 %v77_v0  ;;  %539 = vmatprep.subr.mxu0 %v124_v1 }
  0x24   :  { %532 = vmatpush3.msra.mxu1 %v61_v2  ;;  %280 = vmatprep.mubr.f32.mxu1 %v18_v3 }
  0x25   :  { %540 = vmatpush3.msra.mxu0 %v108_v4  ;;  %281 = vmatmul.mubr.f32.vlgmr.msra.gmra.mxu1 %v17_v5 }
  0x26   :  { %541 = vmatprep.subr.mxu0 %v123_v6  ;;  %210 = vmatprep.mubr.f32.mxu0 %v23_v8 }
  0x27   :  { %542 = vmatpush3.msra.mxu0 %v107_v7 }
  0x28   :  { %8 = vsyncpa [#allocation3], 0  ;;  %543 = vmatprep.subr.mxu0 %v122_v9  ;;  %v105_v15 = vld [vmem:[%s979_s1 + $0x260] sm:$0xff]  ;;  %211 = vmatmul.mubr.f32.gmra.mxu0 %v22_v10  ;;  %v20_v16 = vld [vmem:[%s978_s0 + $0x28] sm:$0xff]  ;;  %vm134_vm0 = vcmask 130048   ;;  %vm441_vm1 = vcmask 80896  }
  0x29   :  { %544 = vmatpush3.msra.mxu0 %v106_v11  ;;  %v120_v17 = vld [vmem:[%s979_s1 + $0x2d8] sm:$0xff]  ;;  %285 = vmatprep.mubr.f32.mxu1 %v25_v12  ;;  %v126_v18 = vld [vmem:[%s979_s1 + $0x308] sm:$0xff]  ;;  %v119_v20 = vld [vmem:[%s979_s1 + $0x2d0] sm:$0xff] }
  0x2a   :  { %545 = vmatprep.subr.mxu0 %v121_v13  ;;  %v104_v19 = vld [vmem:[%s979_s1 + $0x258] sm:$0xff]  ;;  %286 = vmatmul.mubr.f32.gmra.mxu1 %v24_v14  ;;  %v125_v21 = vld [vmem:[%s979_s1 + $0x300] sm:$0xff]  ;;  %v103_v22 = vld [vmem:[%s979_s1 + $0x250] sm:$0xff] }
  0x2b   :  { %546 = vmatpush3.msra.mxu0 %v105_v15  ;;  %355 = vmatprep.mubr.f32.mxu0 %v20_v16  ;;  %v118_v23 = vld [vmem:[%s979_s1 + $0x2c8] sm:$0xff]  ;;  %v21_v24 = vld [vmem:[%s978_s0 + $0x30] sm:$0xff]  ;;  %v117_v27 = vld [vmem:[%s979_s1 + $0x2c0] sm:$0xff] }
  0x2c   :  { %547 = vmatprep.subr.mxu0 %v120_v17  ;;  %581 = vmatprep.subr.mxu1 %v126_v18  ;;  %v102_v25 = vld [vmem:[%s979_s1 + $0x248] sm:$0xff]  ;;  %v101_v28 = vld [vmem:[%s979_s1 + $0x240] sm:$0xff]  ;;  %v116_v29 = vld [vmem:[%s979_s1 + $0x2b8] sm:$0xff] }
  0x2d   :  { %548 = vmatpush3.msra.mxu0 %v104_v19  ;;  %582 = vmatpush3.msra.mxu1 %v126_v18  ;;  %v28_v26 = vld [vmem:[%s978_s0 + $0x68] sm:$0xff]  ;;  %v100_v30 = vld [vmem:[%s979_s1 + $0x238] sm:$0xff]  ;;  %v115_v31 = vld [vmem:[%s979_s1 + $0x2b0] sm:$0xff] }
  0x2e   :  { %549 = vmatprep.subr.mxu0 %v119_v20  ;;  %583 = vmatprep.subr.mxu1 %v125_v21  ;;  %v99_v32 = vld [vmem:[%s979_s1 + $0x230] sm:$0xff]  ;;  %v114_v33 = vld [vmem:[%s979_s1 + $0x2a8] sm:$0xff]  ;;  %v113_v35 = vld [vmem:[%s979_s1 + $0x2a0] sm:$0xff] }
  0x2f   :  { %550 = vmatpush3.msra.mxu0 %v103_v22  ;;  %584 = vmatpush3.msra.mxu1 %v125_v21  ;;  %v98_v34 = vld [vmem:[%s979_s1 + $0x228] sm:$0xff]  ;;  %v97_v36 = vld [vmem:[%s979_s1 + $0x220] sm:$0xff]  ;;  %v112_v37 = vld [vmem:[%s979_s1 + $0x298] sm:$0xff] }
  0x30   :  { %551 = vmatprep.subr.mxu0 %v118_v23  ;;  %585 = vmatprep.mubr.msk.f32.mxu1 %vm134_vm0, %v21_v24  ;;  %v96_v38 = vld [vmem:[%s979_s1 + $0x218] sm:$0xff]  ;;  %v111_v39 = vld [vmem:[%s979_s1 + $0x290] sm:$0xff]  ;;  %v110_v41 = vld [vmem:[%s979_s1 + $0x288] sm:$0xff] }
  0x31   :  { %552 = vmatpush3.msra.mxu0 %v102_v25  ;;  %586 = vmatmul.mubr.msk.f32.vlgmr.msra.gmra.mxu1 %vm134_vm0, %v28_v26  ;;  %v95_v40 = vld [vmem:[%s979_s1 + $0x210] sm:$0xff]  ;;  %v94_v42 = vld [vmem:[%s979_s1 + $0x208] sm:$0xff]  ;;  %v109_v43 = vld [vmem:[%s979_s1 + $0x280] sm:$0xff] }
  0x32   :  { %553 = vmatprep.subr.mxu0 %v117_v27  ;;  %v93_v44 = vld [vmem:[%s979_s1 + $0x200] sm:$0xff]  ;;  %v26_v47 = vld [vmem:[%s978_s0 + $0x58] sm:$0xff] }
  0x33   :  { %554 = vmatpush3.msra.mxu0 %v101_v28  ;;  %v19_v45 = vld [vmem:[%s978_s0 + $0x20] sm:$0xff] }
  0x34   :  { %555 = vmatprep.subr.mxu0 %v116_v29  ;;  %v27_v46 = vld [vmem:[%s978_s0 + $0x60] sm:$0xff]  ;;  %s613_s0 = smov [#allocation2]  }
  0x35   :  { %556 = vmatpush3.msra.mxu0 %v100_v30  ;;  %v460_v55 = vld [vmem:[%s980_s2] ss:$0 sm:$0xff]  ;;  %s449_s2 = sshll.u32 %s613_s0, 4  ;;  %s450_s2 = int_to_ptr.vmem [resolvable:$true] %s449_s2 }
  0x36   :  { %557 = vmatprep.subr.mxu0 %v115_v31  ;;  %s591_s21 = scalar_lea.vmem %s450_s2, 256  ;;  %p596_p1 = scmp.lt.s32.totalorder %s450_s2, %s450_s2 }
  0x37   :  { %558 = vmatpush3.msra.mxu0 %v99_v32  ;;  %p592_p0 = scmp.ne.s32.totalorder %s450_s2, %s591_s21  ;;  %p597_p2 = scmp.lt.s32.totalorder %s591_s21, %s591_s21 }
  0x38   :  { %559 = vmatprep.subr.mxu0 %v114_v33 }
  0x39   :  { %560 = vmatpush3.msra.mxu0 %v98_v34  ;;  %p598_p3 = por %p597_p2, %p596_p1 }
  0x3a   :  { %561 = vmatprep.subr.mxu0 %v113_v35 }
  0x3b   :  { %562 = vmatpush3.msra.mxu0 %v97_v36  ;;  %p599_p4 = pnand %p598_p3, %p592_p0 }
  0x3c   :  { %563 = vmatprep.subr.mxu0 %v112_v37 }
  0x3d   :  { %564 = vmatpush3.msra.mxu0 %v96_v38 }
  0x3e   :  { %565 = vmatprep.subr.mxu0 %v111_v39 }
  0x3f   :  { %566 = vmatpush3.msra.mxu0 %v95_v40 }
  0x40   :  { %567 = vmatprep.subr.mxu0 %v110_v41 }
  0x41   :  { %568 = vmatpush3.msra.mxu0 %v94_v42 }
  0x42   :  { %569 = vmatprep.subr.mxu0 %v109_v43 }
  0x43   :  { %570 = vmatpush3.msra.mxu0 %v93_v44 }
  0x44   :  { %356 = vmatmul.mubr.f32.vlgmr.msra.gmra.mxu0 %v19_v45 }
  0x45   :  { %360 = vmatprep.mubr.f32.mxu0 %v27_v46 }
  0x48   :  { %361 = vmatmul.mubr.f32.gmra.mxu0 %v26_v47 }
  0xe2   :  { %v495_v48 = vpop.f32.mrf.mxu0 }
  0xe4   :  { %v496_v50 = vpop.f32.mrf.mxu0 }
  0xe5   :  { %v533_v49 = vpop.f32.mrf.mxu1  ;;  %v497_v54 = vadd.f32 %v496_v50, %v495_v48 }
  0xe7   :  { %v534_v51 = vpop.f32.mrf.mxu1  ;;  %v208_v58 = vadd.f32 %v497_v54, %v460_v55 }
  0xe8   :  { %v498_v52 = vpop.f32.mrf.mxu0  ;;  %v535_v59 = vadd.f32 %v534_v51, %v533_v49 }
  0xea   :  { %v536_v53 = vpop.f32.mrf.mxu1  ;;  %v499_v56 = vpop.f32.mrf.mxu0  ;;  %v283_v0 = vadd.f32 %v535_v59, %v208_v58 }
  0xeb   :  { %v500_v60 = vadd.f32 %v499_v56, %v498_v52 }
  0xec   :  { %v537_v57 = vpop.f32.mrf.mxu1 }
  0xed   :  { %v213_v1 = vadd.f32 %v500_v60, %v460_v55  ;;  %v538_v2 = vadd.f32 %v537_v57, %v536_v53 }
  0xef   :  { %v288_v8 = vadd.f32 %v538_v2, %v213_v1 }
  0xf1   :  { %v587_v62 = vpop.f32.mrf.mxu1 }
  0xf3   :  { %v432_v5 = vpop.f32.mrf.mxu1 }
 0x104   :  { %v571_v61 = vpop.f32.mrf.mxu0 }
 0x106   :  { %v572_v63 = vpop.f32.mrf.mxu0 }
 0x107   :  { %v573_v3 = vadd.f32 %v572_v63, %v571_v61 }
 0x108   :  { %v574_v4 = vpop.f32.mrf.mxu0 }
 0x109   :  { %v358_v6 = vadd.f32 %v573_v3, %v283_v0 }
 0x10a   :  { %v575_v7 = vpop.f32.mrf.mxu0 }
 0x10b   :  { %v576_v9 = vadd.f32 %v575_v7, %v574_v4  ;;  %v433_v10 = vadd.f32 %v432_v5, %v358_v6 }
 0x10d   :  { %v363_v11 = vadd.f32 %v576_v9, %v288_v8  ;;  %442 = vst.msk [vmem:[#allocation2] sm:$0xff] %vm441_vm1, %v433_v10 }
 0x10f   :  { %v438_v12 = vadd.f32 %v587_v62, %v363_v11 }
 0x111   :  { %443 = vst.msk [vmem:[#allocation2 + $0x8] sm:$0xff] %vm441_vm1, %v438_v12 }
 0x112   :  { %602 = shalt.err (!%p599_p4)
}
 0x113   :  { %s614_s22 = smov 128   ;;  %s615_s23 = smov 8  }
 0x114   :  { %455 = dma.vmem_to_hbm [thread:$0]  %s450_s2, 256, %s981_s3, [#allocation3], %s614_s22, %s614_s22, %s615_s23  }
 0x115   :  { %611 = dma.done.wait [#allocation3], 256  }
 0x116   :  { %612 = vsyncadd [#allocation3], 4294967040 }
 0x117   :  { %459 = vsyncpa [#allocation3], 1 }

</bundles_post_ra>
